<compile_context>
chip_gen: v6e
topology: v6e:2x2x1
jax: 0.10.0
libtpu: 0.0.40
codegen_flags: <defaults>
</compile_context>

<pallas_src>
import jax
import jax.numpy as jnp
from jax.experimental import pallas as pl
from jax.experimental.pallas import tpu as pltpu

H1, H2 = 400, 300          # logical hidden widths (matches the PyTorch module)
H1_PAD, H2_PAD = 512, 384  # lane-padded widths used on device
LANE = 128
TILE_B_MAX = 2048          # big batch tiles amortize per-grid-step overhead


def _round_up(x, m):
    return ((x + m - 1) // m) * m


def _cdiv(a, b):
    return -(-a // b)


def _actor_kernel(ma_ref, x_ref, w1_ref, w2_ref, w3_ref, b_ref, o_ref):
    """One batch tile: three back-to-back MXU matmuls with fused relu/relu/tanh."""
    max_action = ma_ref[0, 0]
    cdt = w1_ref.dtype  # compute dtype for MXU inputs (bf16 by default)

    # Static, lane-aligned slices of the concatenated (zero-padded) bias vector.
    b1 = b_ref[:, :H1_PAD]                       # (1, 512)
    b2 = b_ref[:, H1_PAD:H1_PAD + H2_PAD]        # (1, 384)
    b3 = b_ref[:, H1_PAD + H2_PAD:]              # (1, A_PAD) lane-dense

    a = jnp.dot(x_ref[...].astype(cdt), w1_ref[...],
                preferred_element_type=jnp.float32)
    a = jnp.maximum(a + b1, 0.0)
    a = jnp.dot(a.astype(cdt), w2_ref[...], preferred_element_type=jnp.float32)
    a = jnp.maximum(a + b2, 0.0)
    a = jnp.dot(a.astype(cdt), w3_ref[...], preferred_element_type=jnp.float32)
    o_ref[...] = (max_action * jnp.tanh(a + b3)).astype(o_ref.dtype)


def _choose_batch_tiling(B):
    """Near-equal, 8-aligned batch tiles; >=2 tiles when B >= 16 (v7x megacore)."""
    n_min = 2 if B >= 16 else 1
    n_tiles = max(n_min, _cdiv(B, TILE_B_MAX))
    tile_b = _round_up(_cdiv(B, n_tiles), 8)
    return n_tiles, tile_b


def actor_forward(state, packed, max_action):
    """state: (B, state_dim) f32. packed: dict from pack_params()."""
    w1, w2, w3, b_all = packed["w1"], packed["w2"], packed["w3"], packed["b_all"]
    action_dim = packed["action_dim"]
    B, S = state.shape
    a_pad = w3.shape[1]

    n_tiles, tile_b = _choose_batch_tiling(B)
    b_pad = n_tiles * tile_b
    x = state if b_pad == B else jnp.pad(state, ((0, b_pad - B), (0, 0)))
    ma = jnp.asarray(max_action, jnp.float32).reshape(1, 1)

    nbytes = lambda a: a.size * a.dtype.itemsize
    flops = 2 * b_pad * (S * H1_PAD + H1_PAD * H2_PAD + H2_PAD * a_pad)
    bytes_accessed = (nbytes(x) + nbytes(w1) + nbytes(w2) + nbytes(w3)
                      + nbytes(b_all) + b_pad * a_pad * 4)

    out = pl.pallas_call(
        _actor_kernel,
        out_shape=jax.ShapeDtypeStruct((b_pad, a_pad), jnp.float32),
        grid=(n_tiles,),
        in_specs=[
            pl.BlockSpec(memory_space=pltpu.MemorySpace.SMEM),   # max_action scalar
            pl.BlockSpec((tile_b, S), lambda i: (i, 0)),         # x: batch-tiled
            pl.BlockSpec(w1.shape, lambda i: (0, 0)),            # weights: VMEM-resident
            pl.BlockSpec(w2.shape, lambda i: (0, 0)),
            pl.BlockSpec(w3.shape, lambda i: (0, 0)),
            pl.BlockSpec(b_all.shape, lambda i: (0, 0)),         # all biases, one DMA
        ],
        out_specs=pl.BlockSpec((tile_b, a_pad), lambda i: (i, 0)),
        compiler_params=pltpu.CompilerParams(
            dimension_semantics=("parallel",)),
        cost_estimate=pl.CostEstimate(flops=flops,
                                      transcendentals=b_pad * a_pad,
                                      bytes_accessed=bytes_accessed),
    )(ma, x, w1, w2, w3, b_all)
    # Slice off both batch padding and action-dim lane padding.
    return out[:B, :action_dim]


def init_params(key, state_dim, action_dim):
    """Logical (unpadded, f32) params mimicking nn.Linear U(-1/sqrt(fan_in), ...)."""
    ks = jax.random.split(key, 6)

    def linear(kw, kb, fan_in, fan_out):
        bound = float(fan_in) ** -0.5
        w = jax.random.uniform(kw, (fan_in, fan_out), jnp.float32, -bound, bound)
        b = jax.random.uniform(kb, (fan_out,), jnp.float32, -bound, bound)
        return w, b

    w1, b1 = linear(ks[0], ks[1], state_dim, H1)
    w2, b2 = linear(ks[2], ks[3], H1, H2)
    w3, b3 = linear(ks[4], ks[5], H2, action_dim)
    return dict(w1=w1, b1=b1, w2=w2, b2=b2, w3=w3, b3=b3)


def pack_params(params, weight_dtype=jnp.bfloat16):
    """Pad hidden/action dims to lane multiples, cast weights, concatenate biases."""
    action_dim = params["w3"].shape[1]
    a_pad = _round_up(action_dim, LANE)
    w1 = jnp.pad(params["w1"], ((0, 0), (0, H1_PAD - H1))).astype(weight_dtype)
    w2 = jnp.pad(params["w2"], ((0, H1_PAD - H1), (0, H2_PAD - H2))).astype(weight_dtype)
    w3 = jnp.pad(params["w3"],
                 ((0, H2_PAD - H2), (0, a_pad - action_dim))).astype(weight_dtype)
    b1 = jnp.pad(params["b1"], (0, H1_PAD - H1))
    b2 = jnp.pad(params["b2"], (0, H2_PAD - H2))
    b3 = jnp.pad(params["b3"], (0, a_pad - action_dim))
    b_all = jnp.concatenate([b1, b2, b3])[None, :].astype(jnp.float32)
    return dict(w1=w1, w2=w2, w3=w3, b_all=b_all, action_dim=action_dim)


def actor_reference_packed(state, packed, max_action):
    """Pure-JAX reference using the exact same padded/bf16 params and casts."""
    w1, w2, w3, b_all = packed["w1"], packed["w2"], packed["w3"], packed["b_all"]
    cdt = w1.dtype
    b1 = b_all[:, :H1_PAD]
    b2 = b_all[:, H1_PAD:H1_PAD + H2_PAD]
    b3 = b_all[:, H1_PAD + H2_PAD:]
    a = jnp.dot(state.astype(cdt), w1, preferred_element_type=jnp.float32)
    a = jnp.maximum(a + b1, 0.0)
    a = jnp.dot(a.astype(cdt), w2, preferred_element_type=jnp.float32)
    a = jnp.maximum(a + b2, 0.0)
    a = jnp.dot(a.astype(cdt), w3, preferred_element_type=jnp.float32)
    return (max_action * jnp.tanh(a + b3))[:, :packed["action_dim"]]


def actor_reference_f32(state, params, max_action):
    """Full-precision, unpadded reference (original module semantics)."""
    a = jnp.maximum(state @ params["w1"] + params["b1"], 0.0)
    a = jnp.maximum(a @ params["w2"] + params["b2"], 0.0)
    return max_action * jnp.tanh(a @ params["w3"] + params["b3"])


# TODO(synk): `select_action` (host-side list conversion + print) is a Python/host
# helper, not a device kernel; call `actor_forward` and convert on the host instead.

if __name__ == "__main__":
    key = jax.random.PRNGKey(0)
    k_state, k_params, k_state2 = jax.random.split(key, 3)

    state_dim, action_dim, max_action = 16, 8, 2.0
    params = init_params(k_params, state_dim, action_dim)
    packed = pack_params(params)

    # Small batch (exercises batch padding 2 -> 8 rows, single tile).
    state = jax.random.normal(k_state, (2, state_dim), dtype=jnp.float32)
    out = jax.block_until_ready(actor_forward(state, packed, max_action))
    assert out.shape == (2, action_dim)
    ref = actor_reference_packed(state, packed, max_action)
    assert jnp.allclose(out, ref, atol=1e-4, rtol=1e-4), "mismatch vs packed reference"
    ref32 = actor_reference_f32(state, params, max_action)
    assert jnp.allclose(out, ref32, atol=5e-2, rtol=5e-2), "mismatch vs f32 reference"

    # Larger batch (exercises near-equal tiling: 600 rows -> 2 tiles of 304).
    state2 = jax.random.normal(k_state2, (600, state_dim), dtype=jnp.float32)
    out2 = jax.block_until_ready(actor_forward(state2, packed, max_action))
    assert out2.shape == (600, action_dim)
    ref2 = actor_reference_packed(state2, packed, max_action)
    assert jnp.allclose(out2, ref2, atol=1e-4, rtol=1e-4), "mismatch (batch grid)"

    print("KERNEL_OK")
</pallas_src>

<mosaic_0001>
module attributes {stable_mosaic.version = 11 : i64} {
  func.func @_actor_kernel(%arg0: i32, %arg1: memref<1x1xf32, #tpu.memory_space<smem>>, %arg2: memref<8x16xf32, #tpu.memory_space<vmem>>, %arg3: memref<16x512xbf16, #tpu.memory_space<vmem>>, %arg4: memref<512x384xbf16, #tpu.memory_space<vmem>>, %arg5: memref<384x128xbf16, #tpu.memory_space<vmem>>, %arg6: memref<1x1024xf32, #tpu.memory_space<vmem>>, %arg7: memref<8x128xf32, #tpu.memory_space<vmem>>) attributes {dimension_semantics = [#tpu.dimension_semantics<parallel>], iteration_bounds = array<i64: 1>, scalar_prefetch = 0 : i64, scratch_operands = 0 : i64, tpu.core_type = #tpu.core_type<tc>, window_params = [{transform_indices = @transform_0, window_bounds = array<i64: 1, 1>}, {transform_indices = @transform_1, window_bounds = array<i64: 8, 16>}, {pipeline_mode = #tpu.pipeline_mode<synchronous>, transform_indices = @transform_2, window_bounds = array<i64: 16, 512>}, {pipeline_mode = #tpu.pipeline_mode<synchronous>, transform_indices = @transform_3, window_bounds = array<i64: 512, 384>}, {pipeline_mode = #tpu.pipeline_mode<synchronous>, transform_indices = @transform_4, window_bounds = array<i64: 384, 128>}, {pipeline_mode = #tpu.pipeline_mode<synchronous>, transform_indices = @transform_5, window_bounds = array<i64: 1, 1024>}, {transform_indices = @transform_6, window_bounds = array<i64: 8, 128>}]} {
    %c0 = arith.constant 0 : index
    %c0_0 = arith.constant 0 : index
    %0 = memref.load %arg1[%c0, %c0_0] : memref<1x1xf32, #tpu.memory_space<smem>>
    %c0_1 = arith.constant 0 : index
    %c0_2 = arith.constant 0 : index
    %1 = vector.load %arg6[%c0_1, %c0_2] : memref<1x1024xf32, #tpu.memory_space<vmem>>, vector<1x512xf32>
    %c0_3 = arith.constant 0 : index
    %c512 = arith.constant 512 : index
    %2 = vector.load %arg6[%c0_3, %c512] : memref<1x1024xf32, #tpu.memory_space<vmem>>, vector<1x384xf32>
    %c0_4 = arith.constant 0 : index
    %c896 = arith.constant 896 : index
    %3 = vector.load %arg6[%c0_4, %c896] : memref<1x1024xf32, #tpu.memory_space<vmem>>, vector<1x128xf32>
    %c0_5 = arith.constant 0 : index
    %c0_6 = arith.constant 0 : index
    %4 = vector.load %arg2[%c0_5, %c0_6] : memref<8x16xf32, #tpu.memory_space<vmem>>, vector<8x16xf32>
    %5 = arith.truncf %4 : vector<8x16xf32> to vector<8x16xbf16>
    %c0_7 = arith.constant 0 : index
    %c0_8 = arith.constant 0 : index
    %6 = vector.load %arg3[%c0_7, %c0_8] : memref<16x512xbf16, #tpu.memory_space<vmem>>, vector<16x512xbf16>
    %cst = arith.constant dense<0.000000e+00> : vector<8x512xf32>
    %7 = tpu.matmul %5, %6, %cst {dimension_numbers = #tpu.dot_dimension_numbers<[1], [0], [0], [1], [0, 0, 1, 1], [], []>} : vector<8x16xbf16>, vector<16x512xbf16>, vector<8x512xf32> -> vector<8x512xf32>
    %8 = vector.broadcast %1 : vector<1x512xf32> to vector<8x512xf32>
    %9 = arith.addf %7, %8 : vector<8x512xf32>
    %cst_9 = arith.constant 0.000000e+00 : f32
    %10 = vector.broadcast %cst_9 : f32 to vector<8x512xf32>
    %11 = arith.maximumf %9, %10 : vector<8x512xf32>
    %12 = arith.truncf %11 : vector<8x512xf32> to vector<8x512xbf16>
    %c0_10 = arith.constant 0 : index
    %c0_11 = arith.constant 0 : index
    %13 = vector.load %arg4[%c0_10, %c0_11] : memref<512x384xbf16, #tpu.memory_space<vmem>>, vector<512x384xbf16>
    %cst_12 = arith.constant dense<0.000000e+00> : vector<8x384xf32>
    %14 = tpu.matmul %12, %13, %cst_12 {dimension_numbers = #tpu.dot_dimension_numbers<[1], [0], [0], [1], [0, 0, 1, 1], [], []>} : vector<8x512xbf16>, vector<512x384xbf16>, vector<8x384xf32> -> vector<8x384xf32>
    %15 = vector.broadcast %2 : vector<1x384xf32> to vector<8x384xf32>
    %16 = arith.addf %14, %15 : vector<8x384xf32>
    %cst_13 = arith.constant 0.000000e+00 : f32
    %17 = vector.broadcast %cst_13 : f32 to vector<8x384xf32>
    %18 = arith.maximumf %16, %17 : vector<8x384xf32>
    %19 = arith.truncf %18 : vector<8x384xf32> to vector<8x384xbf16>
    %c0_14 = arith.constant 0 : index
    %c0_15 = arith.constant 0 : index
    %20 = vector.load %arg5[%c0_14, %c0_15] : memref<384x128xbf16, #tpu.memory_space<vmem>>, vector<384x128xbf16>
    %cst_16 = arith.constant dense<0.000000e+00> : vector<8x128xf32>
    %21 = tpu.matmul %19, %20, %cst_16 {dimension_numbers = #tpu.dot_dimension_numbers<[1], [0], [0], [1], [0, 0, 1, 1], [], []>} : vector<8x384xbf16>, vector<384x128xbf16>, vector<8x128xf32> -> vector<8x128xf32>
    %22 = vector.broadcast %3 : vector<1x128xf32> to vector<8x128xf32>
    %23 = arith.addf %21, %22 : vector<8x128xf32>
    %24 = math.tanh %23 : vector<8x128xf32>
    %25 = vector.broadcast %0 : f32 to vector<8x128xf32>
    %26 = arith.mulf %25, %24 : vector<8x128xf32>
    %c0_17 = arith.constant 0 : index
    %c0_18 = arith.constant 0 : index
    %27 = vector.load %arg7[%c0_17, %c0_18] : memref<8x128xf32, #tpu.memory_space<vmem>>, vector<8x128xf32>
    tpu.vector_store %arg7[%c0_17, %c0_18], %26 {strides = array<i32>} : memref<8x128xf32, #tpu.memory_space<vmem>>, vector<8x128xf32>,
    return
  }
  func.func @transform_0(%arg0: i32) -> (i32, i32) {
    %c0_i32 = arith.constant 0 : i32
    %c0_i32_0 = arith.constant 0 : i32
    %c0_i32_1 = arith.constant 0 : i32
    return %c0_i32, %c0_i32_0 : i32, i32
  }
  func.func @transform_1(%arg0: i32) -> (i32, i32) {
    %c0_i32 = arith.constant 0 : i32
    %c0_i32_0 = arith.constant 0 : i32
    return %arg0, %c0_i32 : i32, i32
  }
  func.func @transform_2(%arg0: i32) -> (i32, i32) {
    %c0_i32 = arith.constant 0 : i32
    %c0_i32_0 = arith.constant 0 : i32
    %c0_i32_1 = arith.constant 0 : i32
    return %c0_i32, %c0_i32_0 : i32, i32
  }
  func.func @transform_3(%arg0: i32) -> (i32, i32) {
    %c0_i32 = arith.constant 0 : i32
    %c0_i32_0 = arith.constant 0 : i32
    %c0_i32_1 = arith.constant 0 : i32
    return %c0_i32, %c0_i32_0 : i32, i32
  }
  func.func @transform_4(%arg0: i32) -> (i32, i32) {
    %c0_i32 = arith.constant 0 : i32
    %c0_i32_0 = arith.constant 0 : i32
    %c0_i32_1 = arith.constant 0 : i32
    return %c0_i32, %c0_i32_0 : i32, i32
  }
  func.func @transform_5(%arg0: i32) -> (i32, i32) {
    %c0_i32 = arith.constant 0 : i32
    %c0_i32_0 = arith.constant 0 : i32
    %c0_i32_1 = arith.constant 0 : i32
    return %c0_i32, %c0_i32_0 : i32, i32
  }
  func.func @transform_6(%arg0: i32) -> (i32, i32) {
    %c0_i32 = arith.constant 0 : i32
    %c0_i32_0 = arith.constant 0 : i32
    return %arg0, %c0_i32 : i32, i32
  }
}

</mosaic_0001>

<bundles_post_ra>
// kernel: tpu_custom_call.1
= control target key start
LH: loop header
LB: loop body
LE: loop exit
PB: predicated region body
PF: predicated region fallthrough
CT: control target
= control target key end

     0   :  { %12 = vsyncpa [#allocation4], 0  ;;  %s1953_s0 = inlined_call_operand.<no memory space> [shape: f32[1,1], index: 0, kind: input, shape index: {}]   ;;  %s1954_s1 = inlined_call_operand.hbm [shape: f32[8,16], index: 1, kind: input, shape index: {}]   ;;  %s1955_s2 = inlined_call_operand.hbm [shape: bf16[16,512], index: 2, kind: input, shape index: {}]   ;;  %s1956_s3 = inlined_call_operand.hbm [shape: bf16[512,384], index: 3, kind: input, shape index: {}]   ;;  %s1957_s4 = inlined_call_operand.hbm [shape: bf16[384,128], index: 4, kind: input, shape index: {}]   ;;  %s1958_s5 = inlined_call_operand.vmem [shape: f32[1,1024], index: 5, kind: input, shape index: {}]   ;;  %s1959_s6 = inlined_call_operand.hbm [shape: f32[8,128], index: 6, kind: output, shape index: {}]  }
   0x1   :  { %13 = vsyncpa [#allocation7], 0 }
   0x2   :  { %14 = vsyncpa [#allocation10], 0 }
   0x3   :  { %15 = vsyncpa [#allocation5], 0  ;;  %s1851_s21 = smov [#allocation6]  }
   0x4   :  { %s33_s22 = sshll.u32 %s1851_s21, 4  ;;  %s34_s22 = int_to_ptr.vmem [resolvable:$true] %s33_s22 }
   0x5   :  { %s1751_s23 = scalar_lea.vmem %s34_s22, 512  ;;  %p1756_p1 = scmp.lt.s32.totalorder %s34_s22, %s34_s22 }
   0x6   :  { %p1752_p0 = scmp.ne.s32.totalorder %s34_s22, %s1751_s23  ;;  %p1757_p2 = scmp.lt.s32.totalorder %s1751_s23, %s1751_s23 }
   0x8   :  { %p1758_p3 = por %p1757_p2, %p1756_p1 }
   0xa   :  { %p1759_p4 = pnand %p1758_p3, %p1752_p0 }
   0xc   :  { %1762 = shalt.err (!%p1759_p4)
}
   0xd   :  { %s1852_s24 = smov 256   ;;  %s1853_s25 = smov 16  }
   0xe   :  { %39 = dma.hbm_to_vmem [thread:$0]  %s1955_s2, 512, %s34_s22, [#allocation7], %s1852_s24, %s1852_s24, %s1853_s25  }
   0xf   :  { %s1854_s28 = smov [#allocation3]   ;;  %s1855_s30 = smov [#allocation8]  }
  0x10   :  { %s24_s29 = sshll.u32 %s1854_s28, 4  ;;  %s45_s7 = sshll.u32 %s1855_s30, 4  ;;  %s25_s29 = int_to_ptr.vmem [resolvable:$true] %s24_s29  ;;  %s46_s7 = int_to_ptr.vmem [resolvable:$true] %s45_s7 }
  0x11   :  { %s1771_s8 = scalar_lea.vmem %s25_s29, 128  ;;  %p1776_p6 = scmp.lt.s32.totalorder %s25_s29, %s25_s29 }
  0x12   :  { %p1772_p5 = scmp.ne.s32.totalorder %s25_s29, %s1771_s8  ;;  %p1777_p7 = scmp.lt.s32.totalorder %s1771_s8, %s1771_s8 }
  0x14   :  { %p1778_p8 = por %p1777_p7, %p1776_p6 }
  0x16   :  { %p1779_p9 = pnand %p1778_p8, %p1772_p5 }
  0x18   :  { %1782 = shalt.err (!%p1779_p9)
}
  0x19   :  { %27 = dma.hbm_to_vmem [thread:$0]  %s1954_s1, 128, %s25_s29, [#allocation4]  }
  0x1a   :  { %s1791_s11 = scalar_lea.vmem %s46_s7, 12288  ;;  %p1796_p11 = scmp.lt.s32.totalorder %s46_s7, %s46_s7 }
  0x1b   :  { %p1792_p10 = scmp.ne.s32.totalorder %s46_s7, %s1791_s11  ;;  %p1797_p12 = scmp.lt.s32.totalorder %s1791_s11, %s1791_s11 }
  0x1d   :  { %p1798_p13 = por %p1797_p12, %p1796_p11 }
  0x1f   :  { %p1799_p0 = pnand %p1798_p13, %p1792_p10 }
  0x21   :  { %1802 = shalt.err (!%p1799_p0)
}
  0x22   :  { %s1856_s2 = smov 192   ;;  %s1857_s12 = smov 12  }
  0x23   :  { %51 = dma.hbm_to_vmem [thread:$0]  %s1956_s3, 12288, %s46_s7, [#allocation7], %s1856_s2, %s1856_s2, %s1857_s12  }
  0x24   :  { %s1858_s15 = smov [#allocation9]  }
  0x25   :  { %s57_s16 = sshll.u32 %s1858_s15, 4  ;;  %s58_s16 = int_to_ptr.vmem [resolvable:$true] %s57_s16 }
  0x26   :  { %s1811_s17 = scalar_lea.vmem %s58_s16, 3072  ;;  %p1816_p2 = scmp.lt.s32.totalorder %s58_s16, %s58_s16 }
  0x27   :  { %p1812_p1 = scmp.ne.s32.totalorder %s58_s16, %s1811_s17  ;;  %p1817_p3 = scmp.lt.s32.totalorder %s1811_s17, %s1811_s17 }
  0x29   :  { %p1818_p4 = por %p1817_p3, %p1816_p2 }
  0x2b   :  { %p1819_p5 = pnand %p1818_p4, %p1812_p1 }
  0x2d   :  { %1822 = shalt.err (!%p1819_p5)
}
  0x2e   :  { %s1859_s1 = smov 64   ;;  %s1860_s18 = smov 4  }
  0x2f   :  { %63 = dma.hbm_to_vmem [thread:$0]  %s1957_s4, 3072, %s58_s16, [#allocation10], %s1859_s1, %s1859_s1, %s1860_s18  }
  0x30   :  { %1843 = dma.done.wait [#allocation4], 128  }
  0x31   :  { %1844 = vsyncadd [#allocation4], 4294967168 }
  0x32   :  { %1845 = dma.done.wait [#allocation7], 12800  }
  0x33   :  { %1846 = vsyncadd [#allocation7], 4294954496 }
  0x34   :  { %1847 = dma.done.wait [#allocation10], 3072  }
  0x35   :  { %1848 = vsyncadd [#allocation10], 4294964224  ;;  %v1861_v0 = vmov 0   ;;  %v1583_v1 = vld [vmem:[#allocation6 + $0x4] ss:$16 sps:$4 sm:$0xff]   ;;  %v83_v5 = vld [vmem:[#allocation3] sm:$0xff] }
  0x36   :  { %166 = vmatprep.mubr.bf16.mxu0 %v1861_v0  ;;  %207 = vmatprep.mubr.bf16.mxu1 %v1861_v0  ;;  %v1585_v2 = vld [vmem:[#allocation6 + $0xc] ss:$16 sps:$4 sm:$0xff]   ;;  %v1587_v3 = vld [vmem:[#allocation6] ss:$16 sps:$4 sm:$0xff]   ;;  %v1588_v4 = vld [vmem:[#allocation6 + $0x8] ss:$16 sps:$4 sm:$0xff]   ;;  %v84_v6 = vpack.c.bf16 %v83_v5, %v83_v5 }
  0x37   :  { %148 = vmatprep.subr.bf16.mxu0 %v1583_v1  ;;  %189 = vmatprep.subr.bf16.mxu1 %v1585_v2  ;;  %v1589_v7 = vld [vmem:[#allocation8 + $0xa8] ss:$12 sps:$4 sm:$0xff]   ;;  %vm130_vm0 = vcmask 130048   ;;  %v1591_v8 = vld [vmem:[#allocation8 + $0xac] ss:$12 sps:$4 sm:$0xff]   ;;  %vm1863_vm1 = vmmov 0  }
  0x38   :  { %149 = vmatpush1.bf16.msra.mxu0 %v1587_v3  ;;  %190 = vmatpush1.bf16.msra.mxu1 %v1588_v4  ;;  %v1592_v9 = vld [vmem:[#allocation8 + $0x228] ss:$12 sps:$4 sm:$0xff]   ;;  %v1594_v10 = vld [vmem:[#allocation8 + $0x22c] ss:$12 sps:$4 sm:$0xff]   ;;  %v1595_v12 = vld [vmem:[#allocation8 + $0x90] ss:$12 sps:$4 sm:$0xff]  }
  0x39   :  { %880 = vmatprep.subr.bf16.mxu0 %v1591_v8  ;;  %v1597_v11 = vld [vmem:[#allocation8 + $0x94] ss:$12 sps:$4 sm:$0xff]   ;;  %921 = vmatprep.subr.bf16.mxu1 %v1594_v10  ;;  %v1598_v14 = vld [vmem:[#allocation8 + $0x210] ss:$12 sps:$4 sm:$0xff]   ;;  %v1601_v17 = vld [vmem:[#allocation8 + $0x78] ss:$12 sps:$4 sm:$0xff]  }
  0x3a   :  { %v1600_v13 = vld [vmem:[#allocation8 + $0x214] ss:$12 sps:$4 sm:$0xff]   ;;  %v1603_v15 = vld [vmem:[#allocation8 + $0x7c] ss:$12 sps:$4 sm:$0xff]   ;;  %v1604_v18 = vld [vmem:[#allocation8 + $0x1f8] ss:$12 sps:$4 sm:$0xff]  }
  0x3b   :  { %1351 = vmatmul.mubr.msk.bf16.vlgmr.msra.gmra.mxu0 %vm130_vm0, %v84_v6  ;;  %1352 = vmatmul.mubr.msk.bf16.vlgmr.msra.gmra.mxu1 %vm130_vm0, %v84_v6  ;;  %v1606_v16 = vld [vmem:[#allocation8 + $0x1fc] ss:$12 sps:$4 sm:$0xff]   ;;  %v1609_v19 = vld [vmem:[#allocation8 + $0x64] ss:$12 sps:$4 sm:$0xff]   ;;  %v1607_v21 = vld [vmem:[#allocation8 + $0x60] ss:$12 sps:$4 sm:$0xff]  }
  0x3c   :  { %881 = vmatpush1.bf16.msra.mxu0 %v1589_v7  ;;  %922 = vmatpush1.bf16.msra.mxu1 %v1592_v9  ;;  %v1612_v20 = vld [vmem:[#allocation8 + $0x1e4] ss:$12 sps:$4 sm:$0xff]   ;;  %v1610_v22 = vld [vmem:[#allocation8 + $0x1e0] ss:$12 sps:$4 sm:$0xff]   ;;  %v1613_v25 = vld [vmem:[#allocation8 + $0x48] ss:$12 sps:$4 sm:$0xff]   ;;  %v90_v9 = vlaneseq }
  0x3d   :  { %882 = vmatprep.subr.bf16.mxu0 %v1597_v11  ;;  %923 = vmatprep.subr.bf16.mxu1 %v1600_v13  ;;  %v1615_v23 = vld [vmem:[#allocation8 + $0x4c] ss:$12 sps:$4 sm:$0xff]   ;;  %v1616_v26 = vld [vmem:[#allocation8 + $0x1c8] ss:$12 sps:$4 sm:$0xff]   ;;  %v1619_v29 = vld [vmem:[#allocation8 + $0x30] ss:$12 sps:$4 sm:$0xff]  }
  0x3e   :  { %v1618_v24 = vld [vmem:[#allocation8 + $0x1cc] ss:$12 sps:$4 sm:$0xff]   ;;  %v1621_v27 = vld [vmem:[#allocation8 + $0x34] ss:$12 sps:$4 sm:$0xff]   ;;  %v1622_v30 = vld [vmem:[#allocation8 + $0x1b0] ss:$12 sps:$4 sm:$0xff]  }
  0x3f   :  { %v1624_v28 = vld [vmem:[#allocation8 + $0x1b4] ss:$12 sps:$4 sm:$0xff]   ;;  %v1627_v31 = vld [vmem:[#allocation8 + $0x1c] ss:$12 sps:$4 sm:$0xff]   ;;  %v1625_v33 = vld [vmem:[#allocation8 + $0x18] ss:$12 sps:$4 sm:$0xff]  }
  0x40   :  { %883 = vmatpush1.bf16.msra.mxu0 %v1595_v12  ;;  %924 = vmatpush1.bf16.msra.mxu1 %v1598_v14  ;;  %v1630_v32 = vld [vmem:[#allocation8 + $0x19c] ss:$12 sps:$4 sm:$0xff]   ;;  %v1628_v34 = vld [vmem:[#allocation8 + $0x198] ss:$12 sps:$4 sm:$0xff]   ;;  %v1631_v37 = vld [vmem:[#allocation8] ss:$12 sps:$4 sm:$0xff]  }
  0x41   :  { %884 = vmatprep.subr.bf16.mxu0 %v1603_v15  ;;  %925 = vmatprep.subr.bf16.mxu1 %v1606_v16  ;;  %v1633_v35 = vld [vmem:[#allocation8 + $0x4] ss:$12 sps:$4 sm:$0xff]   ;;  %v1634_v38 = vld [vmem:[#allocation8 + $0x180] ss:$12 sps:$4 sm:$0xff]   ;;  %v1637_v41 = vld [vmem:[#allocation8 + $0x168] ss:$12 sps:$4 sm:$0xff]  }
  0x42   :  { %v1636_v36 = vld [vmem:[#allocation8 + $0x184] ss:$12 sps:$4 sm:$0xff]   ;;  %v1639_v39 = vld [vmem:[#allocation8 + $0x16c] ss:$12 sps:$4 sm:$0xff]   ;;  %v1640_v42 = vld [vmem:[#allocation8 + $0x2e8] ss:$12 sps:$4 sm:$0xff]  }
  0x43   :  { %v1642_v40 = vld [vmem:[#allocation8 + $0x2ec] ss:$12 sps:$4 sm:$0xff]   ;;  %v1645_v43 = vld [vmem:[#allocation8 + $0x154] ss:$12 sps:$4 sm:$0xff]   ;;  %v1643_v44 = vld [vmem:[#allocation8 + $0x150] ss:$12 sps:$4 sm:$0xff]  }
  0x44   :  { %885 = vmatpush1.bf16.msra.mxu0 %v1601_v17  ;;  %926 = vmatpush1.bf16.msra.mxu1 %v1604_v18  ;;  %v1648_v45 = vld [vmem:[#allocation8 + $0x2d4] ss:$12 sps:$4 sm:$0xff]   ;;  %v1646_v46 = vld [vmem:[#allocation8 + $0x2d0] ss:$12 sps:$4 sm:$0xff]   ;;  %v1649_v49 = vld [vmem:[#allocation8 + $0x138] ss:$12 sps:$4 sm:$0xff]  }
  0x45   :  { %886 = vmatprep.subr.bf16.mxu0 %v1609_v19  ;;  %927 = vmatprep.subr.bf16.mxu1 %v1612_v20  ;;  %v1651_v47 = vld [vmem:[#allocation8 + $0x13c] ss:$12 sps:$4 sm:$0xff]   ;;  %v1652_v50 = vld [vmem:[#allocation8 + $0x2b8] ss:$12 sps:$4 sm:$0xff]   ;;  %v1655_v53 = vld [vmem:[#allocation8 + $0x120] ss:$12 sps:$4 sm:$0xff]  }
  0x46   :  { %v1654_v48 = vld [vmem:[#allocation8 + $0x2bc] ss:$12 sps:$4 sm:$0xff]   ;;  %v1657_v51 = vld [vmem:[#allocation8 + $0x124] ss:$12 sps:$4 sm:$0xff]   ;;  %v1658_v54 = vld [vmem:[#allocation8 + $0x2a0] ss:$12 sps:$4 sm:$0xff]  }
  0x47   :  { %v1660_v52 = vld [vmem:[#allocation8 + $0x2a4] ss:$12 sps:$4 sm:$0xff]   ;;  %v1663_v55 = vld [vmem:[#allocation8 + $0x10c] ss:$12 sps:$4 sm:$0xff]   ;;  %v1661_v57 = vld [vmem:[#allocation8 + $0x108] ss:$12 sps:$4 sm:$0xff]  }
  0x48   :  { %887 = vmatpush1.bf16.msra.mxu0 %v1607_v21  ;;  %928 = vmatpush1.bf16.msra.mxu1 %v1610_v22  ;;  %v1666_v56 = vld [vmem:[#allocation8 + $0x28c] ss:$12 sps:$4 sm:$0xff]   ;;  %v1664_v58 = vld [vmem:[#allocation8 + $0x288] ss:$12 sps:$4 sm:$0xff]   ;;  %v1667_v61 = vld [vmem:[#allocation8 + $0xf0] ss:$12 sps:$4 sm:$0xff]  }
  0x49   :  { %888 = vmatprep.subr.bf16.mxu0 %v1615_v23  ;;  %929 = vmatprep.subr.bf16.mxu1 %v1618_v24  ;;  %v1669_v59 = vld [vmem:[#allocation8 + $0xf4] ss:$12 sps:$4 sm:$0xff]   ;;  %v1670_v62 = vld [vmem:[#allocation8 + $0x270] ss:$12 sps:$4 sm:$0xff]   ;;  %v1673_v1 = vld [vmem:[#allocation8 + $0xd8] ss:$12 sps:$4 sm:$0xff]  }
  0x4a   :  { %v1672_v60 = vld [vmem:[#allocation8 + $0x274] ss:$12 sps:$4 sm:$0xff]   ;;  %v1675_v63 = vld [vmem:[#allocation8 + $0xdc] ss:$12 sps:$4 sm:$0xff]   ;;  %v1676_v2 = vld [vmem:[#allocation8 + $0x258] ss:$12 sps:$4 sm:$0xff]  }
  0x4b   :  { %v1678_v0 = vld [vmem:[#allocation8 + $0x25c] ss:$12 sps:$4 sm:$0xff]   ;;  %v1681_v3 = vld [vmem:[#allocation8 + $0xc4] ss:$12 sps:$4 sm:$0xff]   ;;  %v1679_v5 = vld [vmem:[#allocation8 + $0xc0] ss:$12 sps:$4 sm:$0xff]  }
  0x4c   :  { %889 = vmatpush1.bf16.msra.mxu0 %v1613_v25  ;;  %930 = vmatpush1.bf16.msra.mxu1 %v1616_v26  ;;  %v1684_v4 = vld [vmem:[#allocation8 + $0x244] ss:$12 sps:$4 sm:$0xff]   ;;  %v1682_v6 = vld [vmem:[#allocation8 + $0x240] ss:$12 sps:$4 sm:$0xff]   ;;  %v1912_v10 = vshrl.u32 %v90_v9, 7  ;;  %s1864_s27 = smov [#allocation11]  }
  0x4d   :  { %890 = vmatprep.subr.bf16.mxu0 %v1621_v27  ;;  %931 = vmatprep.subr.bf16.mxu1 %v1624_v28  ;;  %v1685_v7 = vld [vmem:[#allocation8 + $0x170] ss:$12 sps:$4 sm:$0xff]   ;;  %v80_v13 = vld [vmem:[%s1958_s5] sm:$0xf]  ;;  %s1336_s28 = sshll.u32 %s1864_s27, 4  ;;  %s1337_s28 = int_to_ptr.vmem [resolvable:$true] %s1336_s28 }
  0x4e   :  { %v1686_v8 = vld [vmem:[#allocation8 + $0x2f0] ss:$12 sps:$4 sm:$0xff]   ;;  %v92_v11 = vsub.s32 0, %v1912_v10  ;;  %v100_v12 = vsub.s32 2, %v1912_v10  ;;  %v96_v14 = vsub.s32 1, %v1912_v10  ;;  %v104_v15 = vsub.s32 3, %v1912_v10  ;;  %p1828_p7 = scmp.lt.s32.totalorder %s1337_s28, %s1337_s28 }
  0x4f   :  { %v1720_v9 = vld [vmem:[#allocation9 + $0x30] sm:$0xff]   ;;  %v1449_v10 = vld [vmem:[%s1958_s5 + $0x7] ss:$0 sm:$0xff]  ;;  %s1823_s29 = scalar_lea.vmem %s1337_s28, 128 }
  0x50   :  { %891 = vmatpush1.bf16.msra.mxu0 %v1619_v29  ;;  %932 = vmatpush1.bf16.msra.mxu1 %v1622_v30  ;;  %v93_v16 = vrot.slane %v80_v13, %v92_v11  ;;  %v101_v17 = vrot.slane %v80_v13, %v100_v12  ;;  %v97_v18 = vrot.slane %v80_v13, %v96_v14  ;;  %p1824_p6 = scmp.ne.s32.totalorder %s1337_s28, %s1823_s29  ;;  %p1829_p8 = scmp.lt.s32.totalorder %s1823_s29, %s1823_s29 }
  0x51   :  { %892 = vmatprep.subr.bf16.mxu0 %v1627_v31  ;;  %933 = vmatprep.subr.bf16.mxu1 %v1630_v32  ;;  %v105_v19 = vrot.slane %v80_v13, %v104_v15  ;;  %v1721_v13 = vld [vmem:[#allocation9 + $0x68] sm:$0xff]  }
  0x52   :  { %v1722_v15 = vld [vmem:[#allocation9 + $0x28] sm:$0xff]   ;;  %p1830_p9 = por %p1829_p8, %p1828_p7 }
  0x54   :  { %893 = vmatpush1.bf16.msra.mxu0 %v1625_v33  ;;  %934 = vmatpush1.bf16.msra.mxu1 %v1628_v34  ;;  %p1831_p10 = pnand %p1830_p9, %p1824_p6 }
  0x55   :  { %894 = vmatprep.subr.bf16.mxu0 %v1633_v35  ;;  %935 = vmatprep.subr.bf16.mxu1 %v1636_v36 }
  0x58   :  { %895 = vmatpush1.bf16.msra.mxu0 %v1631_v37  ;;  %936 = vmatpush1.bf16.msra.mxu1 %v1634_v38 }
  0x59   :  { %896 = vmatprep.subr.bf16.mxu0 %v1639_v39  ;;  %937 = vmatprep.subr.bf16.mxu1 %v1642_v40  ;;  %v1687_v39 = vld [vmem:[#allocation8 + $0xb0] ss:$12 sps:$4 sm:$0xff]  }
  0x5a   :  { %v1688_v40 = vld [vmem:[#allocation8 + $0x230] ss:$12 sps:$4 sm:$0xff]  }
  0x5c   :  { %897 = vmatpush2.bf16.msra.mxu0 %v1637_v41  ;;  %938 = vmatpush2.bf16.msra.mxu1 %v1640_v42  ;;  %v1689_v42 = vld [vmem:[#allocation8 + $0x158] ss:$12 sps:$4 sm:$0xff]  }
  0x5d   :  { %898 = vmatprep.subr.bf16.mxu0 %v1645_v43  ;;  %939 = vmatprep.subr.bf16.mxu1 %v1648_v45  ;;  %v1690_v43 = vld [vmem:[#allocation8 + $0x2d8] ss:$12 sps:$4 sm:$0xff]  }
  0x5e   :  { %v1692_v45 = vld [vmem:[#allocation8 + $0x218] ss:$12 sps:$4 sm:$0xff]  }
  0x60   :  { %899 = vmatpush2.bf16.msra.mxu0 %v1643_v44  ;;  %940 = vmatpush2.bf16.msra.mxu1 %v1646_v46  ;;  %v1691_v44 = vld [vmem:[#allocation8 + $0x98] ss:$12 sps:$4 sm:$0xff]   ;;  %v1693_v46 = vld [vmem:[#allocation8 + $0x140] ss:$12 sps:$4 sm:$0xff]  }
  0x61   :  { %900 = vmatprep.subr.bf16.mxu0 %v1651_v47  ;;  %941 = vmatprep.subr.bf16.mxu1 %v1654_v48  ;;  %v1694_v47 = vld [vmem:[#allocation8 + $0x2c0] ss:$12 sps:$4 sm:$0xff]  }
  0x62   :  { %v1695_v48 = vld [vmem:[#allocation8 + $0x80] ss:$12 sps:$4 sm:$0xff]  }
  0x64   :  { %901 = vmatpush2.bf16.msra.mxu0 %v1649_v49  ;;  %942 = vmatpush2.bf16.msra.mxu1 %v1652_v50  ;;  %v1696_v49 = vld [vmem:[#allocation8 + $0x200] ss:$12 sps:$4 sm:$0xff]   ;;  %v1697_v50 = vld [vmem:[#allocation8 + $0x128] ss:$12 sps:$4 sm:$0xff]  }
  0x65   :  { %902 = vmatprep.subr.bf16.mxu0 %v1657_v51  ;;  %943 = vmatprep.subr.bf16.mxu1 %v1660_v52  ;;  %v1698_v51 = vld [vmem:[#allocation8 + $0x2a8] ss:$12 sps:$4 sm:$0xff]  }
  0x66   :  { %v1699_v52 = vld [vmem:[#allocation8 + $0x68] ss:$12 sps:$4 sm:$0xff]  }
  0x68   :  { %903 = vmatpush2.bf16.msra.mxu0 %v1655_v53  ;;  %944 = vmatpush2.bf16.msra.mxu1 %v1658_v54  ;;  %v1700_v53 = vld [vmem:[#allocation8 + $0x1e8] ss:$12 sps:$4 sm:$0xff]   ;;  %v1701_v54 = vld [vmem:[#allocation8 + $0x110] ss:$12 sps:$4 sm:$0xff]  }
  0x69   :  { %904 = vmatprep.subr.bf16.mxu0 %v1663_v55  ;;  %945 = vmatprep.subr.bf16.mxu1 %v1666_v56  ;;  %v1702_v55 = vld [vmem:[#allocation8 + $0x290] ss:$12 sps:$4 sm:$0xff]  }
  0x6a   :  { %v1703_v56 = vld [vmem:[#allocation8 + $0x50] ss:$12 sps:$4 sm:$0xff]  }
  0x6c   :  { %905 = vmatpush2.bf16.msra.mxu0 %v1661_v57  ;;  %946 = vmatpush2.bf16.msra.mxu1 %v1664_v58  ;;  %v1704_v57 = vld [vmem:[#allocation8 + $0x1d0] ss:$12 sps:$4 sm:$0xff]   ;;  %v1705_v58 = vld [vmem:[#allocation8 + $0xf8] ss:$12 sps:$4 sm:$0xff]  }
  0x6d   :  { %906 = vmatprep.subr.bf16.mxu0 %v1669_v59  ;;  %947 = vmatprep.subr.bf16.mxu1 %v1672_v60  ;;  %v1706_v59 = vld [vmem:[#allocation8 + $0x278] ss:$12 sps:$4 sm:$0xff]  }
  0x6e   :  { %v1707_v60 = vld [vmem:[#allocation8 + $0x38] ss:$12 sps:$4 sm:$0xff]  }
  0x70   :  { %907 = vmatpush2.bf16.msra.mxu0 %v1667_v61  ;;  %948 = vmatpush2.bf16.msra.mxu1 %v1670_v62  ;;  %v1708_v61 = vld [vmem:[#allocation8 + $0x1b8] ss:$12 sps:$4 sm:$0xff]   ;;  %v1709_v62 = vld [vmem:[#allocation8 + $0xe0] ss:$12 sps:$4 sm:$0xff]  }
  0x71   :  { %908 = vmatprep.subr.bf16.mxu0 %v1675_v63  ;;  %949 = vmatprep.subr.bf16.mxu1 %v1678_v0  ;;  %v1710_v63 = vld [vmem:[#allocation8 + $0x260] ss:$12 sps:$4 sm:$0xff]  }
  0x72   :  { %v1711_v0 = vld [vmem:[#allocation8 + $0x20] ss:$12 sps:$4 sm:$0xff]  }
  0x74   :  { %909 = vmatpush2.bf16.msra.mxu0 %v1673_v1  ;;  %950 = vmatpush2.bf16.msra.mxu1 %v1676_v2  ;;  %v1712_v1 = vld [vmem:[#allocation8 + $0x1a0] ss:$12 sps:$4 sm:$0xff]   ;;  %v1713_v2 = vld [vmem:[#allocation8 + $0xc8] ss:$12 sps:$4 sm:$0xff]  }
  0x75   :  { %910 = vmatprep.subr.bf16.mxu0 %v1681_v3  ;;  %951 = vmatprep.subr.bf16.mxu1 %v1684_v4  ;;  %v1714_v3 = vld [vmem:[#allocation8 + $0x248] ss:$12 sps:$4 sm:$0xff]  }
  0x76   :  { %v1715_v4 = vld [vmem:[#allocation8 + $0x8] ss:$12 sps:$4 sm:$0xff]  }
  0x78   :  { %911 = vmatpush2.bf16.msra.mxu0 %v1679_v5  ;;  %952 = vmatpush2.bf16.msra.mxu1 %v1682_v6  ;;  %v1716_v5 = vld [vmem:[#allocation8 + $0x188] ss:$12 sps:$4 sm:$0xff]   ;;  %v1717_v6 = vld [vmem:[#allocation9 + $0x78] sm:$0xff]  }
  0x79   :  { %1474 = vmatprep.subr.bf16.mxu0 %v1685_v7  ;;  %1496 = vmatprep.subr.bf16.mxu1 %v1686_v8  ;;  %v1718_v7 = vld [vmem:[#allocation9 + $0x38] sm:$0xff]   ;;  %v1719_v8 = vld [vmem:[#allocation9 + $0x70] sm:$0xff]  }
  0xfb   :  { %v168_v20 = vpop.f32.mrf.mxu0  ;;  %v209_v21 = vpop.f32.mrf.mxu1 }
  0xfc   :  { %v169_v22 = vadd.f32 %v168_v20, %v93_v16  ;;  %v210_v23 = vadd.f32 %v209_v21, %v101_v17  ;;  %v1723_v16 = vld [vmem:[#allocation9 + $0x60] sm:$0xff]   ;;  %v1727_v20 = vld [vmem:[#allocation9 + $0x50] sm:$0xff]  }
  0xfd   :  { %v170_v24 = vpop.f32.mrf.mxu0  ;;  %v211_v25 = vpop.f32.mrf.mxu1  ;;  %v1724_v17 = vld [vmem:[#allocation9 + $0x20] sm:$0xff]   ;;  %v1728_v21 = vld [vmem:[#allocation9 + $0x10] sm:$0xff]  }
  0xfe   :  { %v218_v26 = vmax.f32 %v210_v23, 0.0  ;;  %v171_v27 = vadd.f32 %v170_v24, %v97_v18  ;;  %v212_v28 = vadd.f32 %v211_v25, %v105_v19  ;;  %v216_v29 = vmax.f32 %v169_v22, 0.0  ;;  %v1725_v18 = vld [vmem:[#allocation9 + $0x58] sm:$0xff]   ;;  %v1729_v22 = vld [vmem:[#allocation9 + $0x48] sm:$0xff]   ;;  %v1731_v24 = vld [vmem:[#allocation9 + $0x40] sm:$0xff]  }
  0xff   :  { %v172_v30 = vpop.f32.mrf.mxu0  ;;  %v213_v31 = vpop.f32.mrf.mxu1  ;;  %v1726_v19 = vld [vmem:[#allocation9 + $0x18] sm:$0xff]   ;;  %v1730_v23 = vld [vmem:[#allocation9 + $0x8] sm:$0xff]   ;;  %v1732_v25 = vld [vmem:[#allocation9] sm:$0xff]  }
 0x100   :  { %v217_v32 = vmax.f32 %v171_v27, 0.0  ;;  %v219_v33 = vmax.f32 %v212_v28, 0.0  ;;  %v1927_v34 = vpack.c.bf16 %v218_v26, %v218_v26  ;;  %v1929_v41 = vpack.c.bf16 %v216_v29, %v216_v29  ;;  %v1733_v26 = vld [vmem:[#allocation9 + $0xb8] sm:$0xff]   ;;  %v1734_v28 = vld [vmem:[#allocation9 + $0xb0] sm:$0xff]   ;;  %v1735_v29 = vld [vmem:[#allocation9 + $0xa8] sm:$0xff]  }
 0x101   :  { %v173_v35 = vpop.f32.mrf.mxu0  ;;  %v214_v36 = vpop.f32.mrf.mxu1  ;;  %v1862_v27 = vmov 0.0   ;;  %v1736_v30 = vld [vmem:[#allocation9 + $0xa0] sm:$0xff]   ;;  %v1737_v31 = vld [vmem:[#allocation9 + $0x98] sm:$0xff]  }
 0x102   :  { %v221_v37 = vpack.c.bf16 %v217_v32, %v217_v32  ;;  %v223_v38 = vpack.c.bf16 %v219_v33, %v219_v33  ;;  %v1738_v32 = vld [vmem:[#allocation9 + $0x90] sm:$0xff]   ;;  %v1739_v33 = vld [vmem:[#allocation9 + $0x88] sm:$0xff]   ;;  %v81_v35 = vld [vmem:[%s1958_s5 + $0x4] sm:$0x7] }
 0x103   :  { %v356_v36 = vrot.slane %v81_v35, %v92_v11 }
 0x104   :  { %912 = vmatprep.mubr.bf16.mxu0 %v221_v37  ;;  %953 = vmatprep.mubr.bf16.mxu1 %v223_v38 }
 0x105   :  { %913 = vmatmul.mubr.bf16.vlgmr.msra.gmra.mxu0 %v1929_v41  ;;  %954 = vmatmul.mubr.bf16.vlgmr.msra.gmra.mxu1 %v1927_v34 }
 0x106   :  { %1475 = vmatpush3.bf16.msra.mxu0 %v1687_v39  ;;  %1497 = vmatpush3.bf16.msra.mxu1 %v1688_v40 }
 0x107   :  { %994 = vmatprep.mubr.bf16.mxu0 %v221_v37  ;;  %1034 = vmatprep.mubr.bf16.mxu1 %v223_v38  ;;  %v360_v37 = vrot.slane %v81_v35, %v96_v14 }
 0x108   :  { %1476 = vmatprep.subr.bf16.mxu0 %v1689_v42  ;;  %1498 = vmatprep.subr.bf16.mxu1 %v1690_v43 }
 0x10a   :  { %1477 = vmatpush3.bf16.msra.mxu0 %v1691_v44  ;;  %1499 = vmatpush3.bf16.msra.mxu1 %v1692_v45 }
 0x10b   :  { %1478 = vmatprep.subr.bf16.mxu0 %v1693_v46  ;;  %1500 = vmatprep.subr.bf16.mxu1 %v1694_v47 }
 0x10e   :  { %1479 = vmatpush3.bf16.msra.mxu0 %v1695_v48  ;;  %1501 = vmatpush3.bf16.msra.mxu1 %v1696_v49 }
 0x10f   :  { %1480 = vmatprep.subr.bf16.mxu0 %v1697_v50  ;;  %1502 = vmatprep.subr.bf16.mxu1 %v1698_v51 }
 0x112   :  { %1481 = vmatpush3.bf16.msra.mxu0 %v1699_v52  ;;  %1503 = vmatpush3.bf16.msra.mxu1 %v1700_v53 }
 0x113   :  { %1482 = vmatprep.subr.bf16.mxu0 %v1701_v54  ;;  %1504 = vmatprep.subr.bf16.mxu1 %v1702_v55  ;;  %v364_v54 = vrot.slane %v81_v35, %v100_v12 }
 0x116   :  { %1483 = vmatpush3.bf16.msra.mxu0 %v1703_v56  ;;  %1505 = vmatpush3.bf16.msra.mxu1 %v1704_v57 }
 0x117   :  { %1484 = vmatprep.subr.bf16.mxu0 %v1705_v58  ;;  %1506 = vmatprep.subr.bf16.mxu1 %v1706_v59 }
 0x11a   :  { %1485 = vmatpush3.bf16.msra.mxu0 %v1707_v60  ;;  %1507 = vmatpush3.bf16.msra.mxu1 %v1708_v61 }
 0x11b   :  { %1486 = vmatprep.subr.bf16.mxu0 %v1709_v62  ;;  %1508 = vmatprep.subr.bf16.mxu1 %v1710_v63 }
 0x11e   :  { %1487 = vmatpush3.bf16.msra.mxu0 %v1711_v0  ;;  %1509 = vmatpush3.bf16.msra.mxu1 %v1712_v1 }
 0x11f   :  { %1488 = vmatprep.subr.bf16.mxu0 %v1713_v2  ;;  %1510 = vmatprep.subr.bf16.mxu1 %v1714_v3 }
 0x122   :  { %1489 = vmatpush3.bf16.msra.mxu0 %v1715_v4  ;;  %1511 = vmatpush3.bf16.msra.mxu1 %v1716_v5 }
 0x123   :  { %1518 = vmatprep.subr.bf16.mxu0 %v1717_v6  ;;  %1549 = vmatprep.subr.bf16.mxu1 %v1862_v27 }
 0x125   :  { %995 = vmatmul.mubr.bf16.vlgmr.msra.gmra.mxu0 %v1929_v41  ;;  %1035 = vmatmul.mubr.bf16.vlgmr.msra.gmra.mxu1 %v1927_v34  ;;  %v1740_v34 = vld [vmem:[#allocation9 + $0x80] sm:$0xff]  }
 0x126   :  { %1519 = vmatpush3.bf16.msra.mxu0 %v1718_v7  ;;  %1550 = vmatpush3.bf16.msra.mxu1 %v1733_v26 }
 0x127   :  { %1520 = vmatprep.subr.bf16.mxu0 %v1719_v8  ;;  %1551 = vmatprep.subr.bf16.mxu1 %v1862_v27 }
 0x128   :  { %1565 = vmatprep.mubr.msk.bf16.mxu1 %vm1863_vm1, %v1862_v27 }
 0x12a   :  { %1521 = vmatpush3.bf16.msra.mxu0 %v1720_v9  ;;  %1552 = vmatpush3.bf16.msra.mxu1 %v1734_v28 }
 0x12b   :  { %1522 = vmatprep.subr.bf16.mxu0 %v1721_v13  ;;  %1553 = vmatprep.subr.bf16.mxu1 %v1862_v27 }
 0x12e   :  { %1523 = vmatpush3.bf16.msra.mxu0 %v1722_v15  ;;  %1554 = vmatpush3.bf16.msra.mxu1 %v1735_v29 }
 0x12f   :  { %1524 = vmatprep.subr.bf16.mxu0 %v1723_v16  ;;  %1555 = vmatprep.subr.bf16.mxu1 %v1862_v27 }
 0x132   :  { %1525 = vmatpush3.bf16.msra.mxu0 %v1724_v17  ;;  %1556 = vmatpush3.bf16.msra.mxu1 %v1736_v30  ;;  %v1327_v17 = vstv %s1953_s0 }
 0x133   :  { %1526 = vmatprep.subr.bf16.mxu0 %v1725_v18  ;;  %1557 = vmatprep.subr.bf16.mxu1 %v1862_v27 }
 0x136   :  { %1527 = vmatpush3.bf16.msra.mxu0 %v1726_v19  ;;  %1558 = vmatpush3.bf16.msra.mxu1 %v1737_v31 }
 0x137   :  { %1528 = vmatprep.subr.bf16.mxu0 %v1727_v20  ;;  %1559 = vmatprep.subr.bf16.mxu1 %v1862_v27 }
 0x13a   :  { %1529 = vmatpush3.bf16.msra.mxu0 %v1728_v21  ;;  %1560 = vmatpush3.bf16.msra.mxu1 %v1738_v32 }
 0x13b   :  { %1530 = vmatprep.subr.bf16.mxu0 %v1729_v22  ;;  %1561 = vmatprep.subr.bf16.mxu1 %v1862_v27 }
 0x13e   :  { %1531 = vmatpush3.bf16.msra.mxu0 %v1730_v23  ;;  %1562 = vmatpush3.bf16.msra.mxu1 %v1739_v33 }
 0x13f   :  { %1532 = vmatprep.subr.bf16.mxu0 %v1731_v24  ;;  %1563 = vmatprep.subr.bf16.mxu1 %v1862_v27 }
 0x142   :  { %1533 = vmatpush3.bf16.msra.mxu0 %v1732_v25  ;;  %1564 = vmatpush3.bf16.msra.mxu1 %v1740_v34 }
 0x1c5   :  { %v914_v38 = vpop.f32.mrf.mxu0  ;;  %v955_v39 = vpop.f32.mrf.mxu1 }
 0x1c6   :  { %v915_v40 = vadd.f32 %v914_v38, %v356_v36 }
 0x1c7   :  { %v916_v41 = vpop.f32.mrf.mxu0  ;;  %v957_v42 = vpop.f32.mrf.mxu1 }
 0x1c8   :  { %v956_v43 = vadd.f32 %v955_v39, %v915_v40  ;;  %v917_v44 = vadd.f32 %v916_v41, %v360_v37 }
 0x1c9   :  { %v918_v45 = vpop.f32.mrf.mxu0  ;;  %v959_v46 = vpop.f32.mrf.mxu1 }
 0x1ca   :  { %v958_v47 = vadd.f32 %v957_v42, %v917_v44  ;;  %v1042_v48 = vmax.f32 %v956_v43, 0.0 }
 0x1cb   :  { %v919_v49 = vpop.f32.mrf.mxu0  ;;  %v960_v50 = vpop.f32.mrf.mxu1 }
 0x1cc   :  { %v1043_v51 = vmax.f32 %v958_v47, 0.0  ;;  %v1045_v53 = vpack.c.bf16 %v1042_v48, %v1042_v48 }
 0x1ce   :  { %v1046_v52 = vpack.c.bf16 %v1043_v51, %v1043_v51 }
 0x1d0   :  { %1278 = vmatprep.mubr.bf16.mxu0 %v1046_v52 }
 0x1d1   :  { %1279 = vmatmul.mubr.bf16.vlgmr.msra.gmra.mxu0 %v1045_v53 }
 0x1e5   :  { %v1490_v11 = vpop.f32.mrf.mxu0  ;;  %v1512_v14 = vpop.f32.mrf.mxu1 }
 0x1e7   :  { %v1491_v55 = vpop.f32.mrf.mxu0  ;;  %v1513_v56 = vpop.f32.mrf.mxu1 }
 0x1e8   :  { %v1492_v57 = vadd.f32 %v1491_v55, %v1490_v11  ;;  %v1514_v61 = vadd.f32 %v1513_v56, %v1512_v14 }
 0x1e9   :  { %v1493_v58 = vpop.f32.mrf.mxu0  ;;  %v1515_v59 = vpop.f32.mrf.mxu1 }
 0x1ea   :  { %v997_v60 = vadd.f32 %v1492_v57, %v364_v54 }
 0x1eb   :  { %v1494_v62 = vpop.f32.mrf.mxu0  ;;  %v1516_v63 = vpop.f32.mrf.mxu1 }
 0x1ec   :  { %v1037_v0 = vadd.f32 %v1514_v61, %v997_v60 }
 0x1ee   :  { %v1044_v1 = vmax.f32 %v1037_v0, 0.0 }
 0x1f0   :  { %v1047_v2 = vpack.c.bf16 %v1044_v1, %v1044_v1 }
 0x1f2   :  { %1566 = vmatmul.mubr.bf16.vlgmr.msra.gmra.mxu1 %v1047_v2 }
 0x291   :  { %v1534_v3 = vpop.f32.mrf.mxu0 }
 0x293   :  { %v1535_v4 = vpop.f32.mrf.mxu0 }
 0x294   :  { %v1536_v7 = vadd.f32 %v1535_v4, %v1534_v3 }
 0x295   :  { %v1537_v5 = vpop.f32.mrf.mxu0 }
 0x296   :  { %v1281_v12 = vadd.f32 %v1536_v7, %v1449_v10 }
 0x297   :  { %v1538_v6 = vpop.f32.mrf.mxu0 }
 0x2b2   :  { %v1320_v8 = vpop.f32.mrf.mxu1 }
 0x2b3   :  { %v1321_v9 = vadd.f32 %v1320_v8, %v1281_v12 }
 0x2b4   :  { %v1567_v13 = vpop.f32.mrf.mxu1 }
 0x2b5   :  { %1741 = vtanh.f32 %v1321_v9 }
 0x2b6   :  { %v1323_v15 = vpop.f32.mrf.mxu1 }
 0x2b8   :  { %v1568_v16 = vpop.f32.mrf.mxu1 }
 0x2c2   :  { %v1742_v18 = vpop.eup %1741 }
 0x2c3   :  { %v1328_v19 = vmul.f32 %v1742_v18, %v1327_v17 }
 0x2c5   :  { %1329 = vst [vmem:[#allocation11] sm:$0xff] %v1328_v19 }
 0x2c6   :  { %1834 = shalt.err (!%p1831_p10)
}
 0x2c7   :  { %1339 = dma.vmem_to_hbm [thread:$0]  %s1337_s28, 128, %s1959_s6, [#allocation5]  }
 0x2c8   :  { %1849 = dma.done.wait [#allocation5], 128  }
 0x2c9   :  { %1850 = vsyncadd [#allocation5], 4294967168 }
 0x2ca   :  { %1343 = vsyncpa [#allocation4], 1 }
 0x2cb   :  { %1344 = vsyncpa [#allocation7], 1 }
 0x2cc   :  { %1345 = vsyncpa [#allocation10], 1 }
 0x2cd   :  { %1346 = vsyncpa [#allocation5], 1 }

</bundles_post_ra>
